<compile_context>
chip_gen: v7x
topology: tpu7x:2x2x1
jax: 0.10.0
libtpu: 0.0.40
codegen_flags: <defaults>
</compile_context>

<pallas_src>
import functools
import math

import jax
import jax.numpy as jnp
from jax.experimental import pallas as pl
from jax.experimental.pallas import tpu as pltpu


def _conv_bn_relu_kernel(x_ref, w_ref, shift_ref, o_ref):
    # x_ref:     (1, D_pad+2, H_pad+2, (W+2)*C_in)  bf16  padded volume of batch n
    # w_ref:     (9, (W+2)*C_in, W*C_out_p)         bf16  width-folded weights (BN scale folded)
    # shift_ref: (1, W*C_out_p)                     f32   folded BN shift
    # o_ref:     (1, tile_d*H_pad, W*C_out_p)       out_dtype
    h = x_ref.shape[2] - 2              # H_pad (multiple of 16)
    k = x_ref.shape[3]                  # (W+2)*C_in
    td_h, n_out = o_ref.shape[1], o_ref.shape[2]
    td = td_h // h                      # tile_d
    d0 = pl.program_id(1) * td

    # One windowed load per grid step (dynamic offset only on the leading D dim).
    if td + 2 == x_ref.shape[1]:        # single D block: full-extent load
        xw = x_ref[0]                                    # (D_pad+2, H_pad+2, K)
    else:
        xw = x_ref[0, pl.ds(d0, td + 2), :, :]           # (td+2,   H_pad+2, K)

    acc = jnp.zeros((td_h, n_out), jnp.float32)
    for kh in range(3):
        # One sublane-offset slice per kh -> 3 relayouts per step instead of 9.
        xh = xw[:, kh:kh + h, :]                         # (td+2, H_pad, K)
        for kd in range(3):
            # Leading-dim slice + tile-aligned reshape (H_pad % 16 == 0): ~free view.
            xs = xh[kd:kd + td].reshape(td_h, k)
            acc = acc + jnp.dot(xs, w_ref[kd * 3 + kh],
                                preferred_element_type=jnp.float32)
    # TODO(synk): for large (W+2)*C_in on v6e/v7x, assemble the nine slabs into one
    # K-concatenated scratch and issue a single deep matmul (256-deep MXU).

    o_ref[0] = jnp.maximum(acc + shift_ref[...], 0.0).astype(o_ref.dtype)


def conv_bn_relu_3d_ndhwc(x_ndhwc, weight, gamma, beta, running_mean, running_var,
                          eps=1e-5, tile_d=None,
                          compute_dtype=jnp.bfloat16, out_dtype=jnp.bfloat16):
    """Fused Conv3d(k=3,s=1,p=1,bias=False) + BatchNorm3d(eval) + ReLU, channel-last.

    x_ndhwc: (N, D, H, W, C_in); weight: (C_out, C_in, 3, 3, 3).
    Returns (N, D, H, W, C_out) in `out_dtype`.
    """
    N, D, H, W, C_in = x_ndhwc.shape
    C_out = weight.shape[0]
    assert weight.shape[1:] == (C_in, 3, 3, 3)

    # ---- fold BatchNorm (eval mode) into per-channel scale / shift (f32) ----
    inv_std = 1.0 / jnp.sqrt(running_var.astype(jnp.float32) + eps)
    scale = gamma.astype(jnp.float32) * inv_std
    shift = beta.astype(jnp.float32) - running_mean.astype(jnp.float32) * scale

    # ---- lane-dense output: pad C_out so W*C_out_p is a multiple of 128 ----
    lane = 128
    c_step = lane // math.gcd(W, lane)
    C_out_p = ((C_out + c_step - 1) // c_step) * c_step
    if W * C_out_p > 2 * max(lane, W * C_out):   # odd W: padding too costly -> accept masked vst
        C_out_p = C_out
    if C_out_p != C_out:
        pad_c = C_out_p - C_out
        weight = jnp.pad(weight, ((0, pad_c),) + ((0, 0),) * 4)
        scale = jnp.pad(scale, (0, pad_c))
        shift = jnp.pad(shift, (0, pad_c))

    K_dim = (W + 2) * C_in
    N_out = W * C_out_p
    H_pad = ((H + 15) // 16) * 16          # sublane-tile aligned row groups (bf16)
    cin_isize = jnp.dtype(compute_dtype).itemsize
    out_isize = jnp.dtype(out_dtype).itemsize

    # ---- D tiling: ~1K output rows per grid step, bounded by VMEM ----
    if tile_d is None:
        tile_d = max(1, 1024 // H_pad)
        tile_d = min(tile_d, max(1, (8 << 20) // max(1, 2 * H_pad * N_out * out_isize)))
    tile_d = max(1, min(tile_d, D))
    n_dblk = pl.cdiv(D, tile_d)
    D_pad = n_dblk * tile_d

    # ---- input: padded NDHWC (channel-last), width folded into the last dim ----
    x = jnp.pad(x_ndhwc.astype(compute_dtype),
                ((0, 0), (1, 1 + D_pad - D), (1, 1 + H_pad - H), (1, 1), (0, 0)))
    x2 = x.reshape(N, D_pad + 2, H_pad + 2, K_dim)

    # ---- width-folded block-Toeplitz weights, BN scale folded in ----
    # B[kd*3+kh, p*C_in+ci, w*C_out_p+co] = scale[co]*weight[co, ci, kd, kh, p-w]
    #   for p - w in {0,1,2}, else 0.
    w_s = weight.astype(jnp.float32) * scale[:, None, None, None, None]
    wk = jnp.transpose(w_s, (2, 3, 4, 1, 0))                    # (kd,kh,kw,Ci,Co_p)
    sel = (jnp.arange(W + 2)[None, :, None]
           == jnp.arange(W)[None, None, :] + jnp.arange(3)[:, None, None]
           ).astype(jnp.float32)                                # (3, W+2, W)
    B = jnp.einsum('kpw,dhkio->dhpiwo', sel, wk)                # (3,3,W+2,Ci,W,Co_p)
    B = B.reshape(9, K_dim, N_out).astype(compute_dtype)
    shift_flat = jnp.tile(shift, W).reshape(1, N_out)           # f32

    # ---- explicit VMEM budget (double-buffered blocks) ----
    in_blk = (D_pad + 2) * (H_pad + 2) * K_dim * cin_isize
    w_blk = 9 * K_dim * N_out * cin_isize
    out_blk = tile_d * H_pad * N_out * out_isize
    footprint = 2 * (in_blk + w_blk + out_blk + N_out * 4)
    vmem_limit = int(min(128 << 20, max(2 * footprint + (8 << 20), 32 << 20)))
    # TODO(synk): if the per-batch padded volume alone approaches v7x's 64 MiB VMEM,
    # switch the input to pl.ANY + manually double-buffered halo D-tiles.
    # TODO(synk): single-buffer the grid-invariant weight/shift blocks to halve
    # their resident VMEM footprint.

    out_flat = pl.pallas_call(
        _conv_bn_relu_kernel,
        out_shape=jax.ShapeDtypeStruct((N, D_pad * H_pad, N_out), out_dtype),
        grid_spec=pltpu.PrefetchScalarGridSpec(
            num_scalar_prefetch=0,
            grid=(N, n_dblk),
            in_specs=[
                # Full padded volume of batch n; constant over d -> DMA'd once, revisited.
                pl.BlockSpec((1, D_pad + 2, H_pad + 2, K_dim),
                             lambda n, d: (n, 0, 0, 0)),
                pl.BlockSpec((9, K_dim, N_out), lambda n, d: (0, 0, 0)),
                pl.BlockSpec((1, N_out), lambda n, d: (0, 0)),
            ],
            out_specs=pl.BlockSpec((1, tile_d * H_pad, N_out),
                                   lambda n, d: (n, d, 0)),
        ),
        compiler_params=pltpu.CompilerParams(
            dimension_semantics=("parallel", "parallel"),
            vmem_limit_bytes=vmem_limit),
    )(x2, B, shift_flat)

    out = out_flat.reshape(N, D_pad, H_pad, W, C_out_p)[:, :D, :H, :, :C_out]
    return out                                                   # NDHWC


def conv_bn_relu_3d(x_ncdhw, weight, gamma, beta, running_mean, running_var,
                    eps=1e-5, tile_d=None,
                    compute_dtype=jnp.bfloat16, out_dtype=jnp.bfloat16):
    """NCDHW adapter matching the PyTorch module's layout.

    Prefer `conv_bn_relu_3d_ndhwc` to avoid the two extra HBM layout passes.
    """
    y = conv_bn_relu_3d_ndhwc(jnp.transpose(x_ncdhw, (0, 2, 3, 4, 1)),
                              weight, gamma, beta, running_mean, running_var,
                              eps=eps, tile_d=tile_d,
                              compute_dtype=compute_dtype, out_dtype=out_dtype)
    return jnp.transpose(y, (0, 4, 1, 2, 3))                     # NCDHW


if __name__ == "__main__":
    key = jax.random.PRNGKey(0)
    k1, k2, k3, k4, k5, k6 = jax.random.split(key, 6)

    N, C_in, C_out, D, H, W = 2, 4, 8, 8, 16, 16

    x = jax.random.normal(k1, (N, C_in, D, H, W), jnp.float32)
    weight = jax.random.normal(k2, (C_out, C_in, 3, 3, 3), jnp.float32) * 0.1
    gamma = 1.0 + 0.1 * jax.random.normal(k3, (C_out,), jnp.float32)
    beta = 0.1 * jax.random.normal(k4, (C_out,), jnp.float32)
    running_mean = 0.1 * jax.random.normal(k5, (C_out,), jnp.float32)
    running_var = jnp.abs(jax.random.normal(k6, (C_out,), jnp.float32)) + 0.5

    eps = 1e-5
    inv_std = 1.0 / jnp.sqrt(running_var + eps)
    scale = gamma * inv_std
    shift = beta - running_mean * scale

    # (a) rounding-consistent reference (same bf16 inputs / BN-folded bf16 weights,
    #     f32 accumulation).
    x_bf = x.astype(jnp.bfloat16).astype(jnp.float32)
    w_bf = (weight * scale[:, None, None, None, None]
            ).astype(jnp.bfloat16).astype(jnp.float32)
    conv_bf = jax.lax.conv_general_dilated(
        x_bf, w_bf, window_strides=(1, 1, 1), padding=[(1, 1)] * 3,
        dimension_numbers=("NCDHW", "OIDHW", "NCDHW"))
    ref_tight = jnp.maximum(conv_bf + shift[None, :, None, None, None], 0.0)

    # (b) full-precision semantic reference (conv -> eval-mode BN -> ReLU).
    conv32 = jax.lax.conv_general_dilated(
        x, weight, window_strides=(1, 1, 1), padding=[(1, 1)] * 3,
        dimension_numbers=("NCDHW", "OIDHW", "NCDHW"))
    ref32 = jnp.maximum(
        (conv32 - running_mean[None, :, None, None, None])
        * scale[None, :, None, None, None]
        + beta[None, :, None, None, None], 0.0)

    # --- test 1: default path (bf16 output, single D block, lane-dense 128) ---
    fused = jax.jit(conv_bn_relu_3d)
    out = jax.block_until_ready(
        fused(x, weight, gamma, beta, running_mean, running_var))
    assert out.shape == (N, C_out, D, H, W)
    out32 = out.astype(jnp.float32)
    assert jnp.allclose(out32, ref_tight, atol=2e-2, rtol=2e-2), \
        "test1: mismatch vs bf16-consistent reference"
    assert jnp.allclose(out32, ref32, atol=6e-2, rtol=6e-2), \
        "test1: mismatch vs f32 reference"

    # --- test 2: f32 output + D tiled into 2 grid blocks (exercises pl.ds path) ---
    fused_f32 = jax.jit(functools.partial(conv_bn_relu_3d,
                                          tile_d=4, out_dtype=jnp.float32))
    out_f32 = jax.block_until_ready(
        fused_f32(x, weight, gamma, beta, running_mean, running_var))
    assert out_f32.shape == (N, C_out, D, H, W)
    assert jnp.allclose(out_f32, ref_tight, atol=2e-3, rtol=2e-3), \
        "test2: mismatch vs bf16-consistent reference"

    # --- test 3: C_out not lane-dense (4*16=64 -> zero-padded to 128 lanes) ---
    out4 = jax.block_until_ready(jax.jit(conv_bn_relu_3d)(
        x, weight[:4], gamma[:4], beta[:4], running_mean[:4], running_var[:4]))
    assert out4.shape == (N, 4, D, H, W)
    assert jnp.allclose(out4.astype(jnp.float32), ref_tight[:, :4],
                        atol=2e-2, rtol=2e-2), "test3: mismatch (padded C_out)"

    print("KERNEL_OK")
</pallas_src>

<mosaic_0001>
module attributes {stable_mosaic.version = 11 : i64} {
  func.func @_conv_bn_relu_kernel(%arg0: i32, %arg1: i32, %arg2: memref<1x10x18x72xbf16, #tpu.memory_space<vmem>>, %arg3: memref<9x72x128xbf16, #tpu.memory_space<vmem>>, %arg4: memref<1x128xf32, #tpu.memory_space<vmem>>, %arg5: memref<1x128x128xbf16, #tpu.memory_space<vmem>>) attributes {dimension_semantics = [#tpu.dimension_semantics<parallel>, #tpu.dimension_semantics<parallel>], iteration_bounds = array<i64: 2, 1>, scalar_prefetch = 0 : i64, scratch_operands = 0 : i64, tpu.core_type = #tpu.core_type<tc>, window_params = [{transform_indices = @transform_0, window_bounds = array<i64: 1, 10, 18, 72>}, {pipeline_mode = #tpu.pipeline_mode<synchronous>, transform_indices = @transform_1, window_bounds = array<i64: 9, 72, 128>}, {pipeline_mode = #tpu.pipeline_mode<synchronous>, transform_indices = @transform_2, window_bounds = array<i64: 1, 128>}, {transform_indices = @transform_3, window_bounds = array<i64: 1, 128, 128>}]} {
    %c0 = arith.constant 0 : index
    %c0_0 = arith.constant 0 : index
    %c0_1 = arith.constant 0 : index
    %c0_2 = arith.constant 0 : index
    %0 = vector.load %arg2[%c0, %c0_0, %c0_1, %c0_2] : memref<1x10x18x72xbf16, #tpu.memory_space<vmem>>, vector<1x10x18x72xbf16>
    %1 = vector.shape_cast %0 : vector<1x10x18x72xbf16> to vector<10x18x72xbf16>
    %cst = arith.constant 0.000000e+00 : f32
    %2 = vector.broadcast %cst : f32 to vector<128x128xf32>
    %3 = vector.extract_strided_slice %1 {offsets = [0, 0, 0], sizes = [10, 16, 72], strides = [1, 1, 1]} : vector<10x18x72xbf16> to vector<10x16x72xbf16>
    %4 = vector.extract_strided_slice %3 {offsets = [0, 0, 0], sizes = [8, 16, 72], strides = [1, 1, 1]} : vector<10x16x72xbf16> to vector<8x16x72xbf16>
    %5 = vector.shape_cast %4 : vector<8x16x72xbf16> to vector<128x72xbf16>
    %c0_3 = arith.constant 0 : index
    %c0_4 = arith.constant 0 : index
    %c0_5 = arith.constant 0 : index
    %6 = vector.load %arg3[%c0_3, %c0_4, %c0_5] : memref<9x72x128xbf16, #tpu.memory_space<vmem>>, vector<1x72x128xbf16>
    %7 = vector.shape_cast %6 : vector<1x72x128xbf16> to vector<72x128xbf16>
    %cst_6 = arith.constant dense<0.000000e+00> : vector<128x128xf32>
    %8 = tpu.matmul %5, %7, %cst_6 {dimension_numbers = #tpu.dot_dimension_numbers<[1], [0], [0], [1], [0, 0, 1, 1], [], []>} : vector<128x72xbf16>, vector<72x128xbf16>, vector<128x128xf32> -> vector<128x128xf32>
    %9 = arith.addf %2, %8 : vector<128x128xf32>
    %10 = vector.extract_strided_slice %3 {offsets = [1, 0, 0], sizes = [8, 16, 72], strides = [1, 1, 1]} : vector<10x16x72xbf16> to vector<8x16x72xbf16>
    %11 = vector.shape_cast %10 : vector<8x16x72xbf16> to vector<128x72xbf16>
    %c3 = arith.constant 3 : index
    %c0_7 = arith.constant 0 : index
    %c0_8 = arith.constant 0 : index
    %12 = vector.load %arg3[%c3, %c0_7, %c0_8] : memref<9x72x128xbf16, #tpu.memory_space<vmem>>, vector<1x72x128xbf16>
    %13 = vector.shape_cast %12 : vector<1x72x128xbf16> to vector<72x128xbf16>
    %cst_9 = arith.constant dense<0.000000e+00> : vector<128x128xf32>
    %14 = tpu.matmul %11, %13, %cst_9 {dimension_numbers = #tpu.dot_dimension_numbers<[1], [0], [0], [1], [0, 0, 1, 1], [], []>} : vector<128x72xbf16>, vector<72x128xbf16>, vector<128x128xf32> -> vector<128x128xf32>
    %15 = arith.addf %9, %14 : vector<128x128xf32>
    %16 = vector.extract_strided_slice %3 {offsets = [2, 0, 0], sizes = [8, 16, 72], strides = [1, 1, 1]} : vector<10x16x72xbf16> to vector<8x16x72xbf16>
    %17 = vector.shape_cast %16 : vector<8x16x72xbf16> to vector<128x72xbf16>
    %c6 = arith.constant 6 : index
    %c0_10 = arith.constant 0 : index
    %c0_11 = arith.constant 0 : index
    %18 = vector.load %arg3[%c6, %c0_10, %c0_11] : memref<9x72x128xbf16, #tpu.memory_space<vmem>>, vector<1x72x128xbf16>
    %19 = vector.shape_cast %18 : vector<1x72x128xbf16> to vector<72x128xbf16>
    %cst_12 = arith.constant dense<0.000000e+00> : vector<128x128xf32>
    %20 = tpu.matmul %17, %19, %cst_12 {dimension_numbers = #tpu.dot_dimension_numbers<[1], [0], [0], [1], [0, 0, 1, 1], [], []>} : vector<128x72xbf16>, vector<72x128xbf16>, vector<128x128xf32> -> vector<128x128xf32>
    %21 = arith.addf %15, %20 : vector<128x128xf32>
    %22 = vector.extract_strided_slice %1 {offsets = [0, 1, 0], sizes = [10, 16, 72], strides = [1, 1, 1]} : vector<10x18x72xbf16> to vector<10x16x72xbf16>
    %23 = vector.extract_strided_slice %22 {offsets = [0, 0, 0], sizes = [8, 16, 72], strides = [1, 1, 1]} : vector<10x16x72xbf16> to vector<8x16x72xbf16>
    %24 = vector.shape_cast %23 : vector<8x16x72xbf16> to vector<128x72xbf16>
    %c1 = arith.constant 1 : index
    %c0_13 = arith.constant 0 : index
    %c0_14 = arith.constant 0 : index
    %25 = vector.load %arg3[%c1, %c0_13, %c0_14] : memref<9x72x128xbf16, #tpu.memory_space<vmem>>, vector<1x72x128xbf16>
    %26 = vector.shape_cast %25 : vector<1x72x128xbf16> to vector<72x128xbf16>
    %cst_15 = arith.constant dense<0.000000e+00> : vector<128x128xf32>
    %27 = tpu.matmul %24, %26, %cst_15 {dimension_numbers = #tpu.dot_dimension_numbers<[1], [0], [0], [1], [0, 0, 1, 1], [], []>} : vector<128x72xbf16>, vector<72x128xbf16>, vector<128x128xf32> -> vector<128x128xf32>
    %28 = arith.addf %21, %27 : vector<128x128xf32>
    %29 = vector.extract_strided_slice %22 {offsets = [1, 0, 0], sizes = [8, 16, 72], strides = [1, 1, 1]} : vector<10x16x72xbf16> to vector<8x16x72xbf16>
    %30 = vector.shape_cast %29 : vector<8x16x72xbf16> to vector<128x72xbf16>
    %c4 = arith.constant 4 : index
    %c0_16 = arith.constant 0 : index
    %c0_17 = arith.constant 0 : index
    %31 = vector.load %arg3[%c4, %c0_16, %c0_17] : memref<9x72x128xbf16, #tpu.memory_space<vmem>>, vector<1x72x128xbf16>
    %32 = vector.shape_cast %31 : vector<1x72x128xbf16> to vector<72x128xbf16>
    %cst_18 = arith.constant dense<0.000000e+00> : vector<128x128xf32>
    %33 = tpu.matmul %30, %32, %cst_18 {dimension_numbers = #tpu.dot_dimension_numbers<[1], [0], [0], [1], [0, 0, 1, 1], [], []>} : vector<128x72xbf16>, vector<72x128xbf16>, vector<128x128xf32> -> vector<128x128xf32>
    %34 = arith.addf %28, %33 : vector<128x128xf32>
    %35 = vector.extract_strided_slice %22 {offsets = [2, 0, 0], sizes = [8, 16, 72], strides = [1, 1, 1]} : vector<10x16x72xbf16> to vector<8x16x72xbf16>
    %36 = vector.shape_cast %35 : vector<8x16x72xbf16> to vector<128x72xbf16>
    %c7 = arith.constant 7 : index
    %c0_19 = arith.constant 0 : index
    %c0_20 = arith.constant 0 : index
    %37 = vector.load %arg3[%c7, %c0_19, %c0_20] : memref<9x72x128xbf16, #tpu.memory_space<vmem>>, vector<1x72x128xbf16>
    %38 = vector.shape_cast %37 : vector<1x72x128xbf16> to vector<72x128xbf16>
    %cst_21 = arith.constant dense<0.000000e+00> : vector<128x128xf32>
    %39 = tpu.matmul %36, %38, %cst_21 {dimension_numbers = #tpu.dot_dimension_numbers<[1], [0], [0], [1], [0, 0, 1, 1], [], []>} : vector<128x72xbf16>, vector<72x128xbf16>, vector<128x128xf32> -> vector<128x128xf32>
    %40 = arith.addf %34, %39 : vector<128x128xf32>
    %41 = vector.extract_strided_slice %1 {offsets = [0, 2, 0], sizes = [10, 16, 72], strides = [1, 1, 1]} : vector<10x18x72xbf16> to vector<10x16x72xbf16>
    %42 = vector.extract_strided_slice %41 {offsets = [0, 0, 0], sizes = [8, 16, 72], strides = [1, 1, 1]} : vector<10x16x72xbf16> to vector<8x16x72xbf16>
    %43 = vector.shape_cast %42 : vector<8x16x72xbf16> to vector<128x72xbf16>
    %c2 = arith.constant 2 : index
    %c0_22 = arith.constant 0 : index
    %c0_23 = arith.constant 0 : index
    %44 = vector.load %arg3[%c2, %c0_22, %c0_23] : memref<9x72x128xbf16, #tpu.memory_space<vmem>>, vector<1x72x128xbf16>
    %45 = vector.shape_cast %44 : vector<1x72x128xbf16> to vector<72x128xbf16>
    %cst_24 = arith.constant dense<0.000000e+00> : vector<128x128xf32>
    %46 = tpu.matmul %43, %45, %cst_24 {dimension_numbers = #tpu.dot_dimension_numbers<[1], [0], [0], [1], [0, 0, 1, 1], [], []>} : vector<128x72xbf16>, vector<72x128xbf16>, vector<128x128xf32> -> vector<128x128xf32>
    %47 = arith.addf %40, %46 : vector<128x128xf32>
    %48 = vector.extract_strided_slice %41 {offsets = [1, 0, 0], sizes = [8, 16, 72], strides = [1, 1, 1]} : vector<10x16x72xbf16> to vector<8x16x72xbf16>
    %49 = vector.shape_cast %48 : vector<8x16x72xbf16> to vector<128x72xbf16>
    %c5 = arith.constant 5 : index
    %c0_25 = arith.constant 0 : index
    %c0_26 = arith.constant 0 : index
    %50 = vector.load %arg3[%c5, %c0_25, %c0_26] : memref<9x72x128xbf16, #tpu.memory_space<vmem>>, vector<1x72x128xbf16>
    %51 = vector.shape_cast %50 : vector<1x72x128xbf16> to vector<72x128xbf16>
    %cst_27 = arith.constant dense<0.000000e+00> : vector<128x128xf32>
    %52 = tpu.matmul %49, %51, %cst_27 {dimension_numbers = #tpu.dot_dimension_numbers<[1], [0], [0], [1], [0, 0, 1, 1], [], []>} : vector<128x72xbf16>, vector<72x128xbf16>, vector<128x128xf32> -> vector<128x128xf32>
    %53 = arith.addf %47, %52 : vector<128x128xf32>
    %54 = vector.extract_strided_slice %41 {offsets = [2, 0, 0], sizes = [8, 16, 72], strides = [1, 1, 1]} : vector<10x16x72xbf16> to vector<8x16x72xbf16>
    %55 = vector.shape_cast %54 : vector<8x16x72xbf16> to vector<128x72xbf16>
    %c8 = arith.constant 8 : index
    %c0_28 = arith.constant 0 : index
    %c0_29 = arith.constant 0 : index
    %56 = vector.load %arg3[%c8, %c0_28, %c0_29] : memref<9x72x128xbf16, #tpu.memory_space<vmem>>, vector<1x72x128xbf16>
    %57 = vector.shape_cast %56 : vector<1x72x128xbf16> to vector<72x128xbf16>
    %cst_30 = arith.constant dense<0.000000e+00> : vector<128x128xf32>
    %58 = tpu.matmul %55, %57, %cst_30 {dimension_numbers = #tpu.dot_dimension_numbers<[1], [0], [0], [1], [0, 0, 1, 1], [], []>} : vector<128x72xbf16>, vector<72x128xbf16>, vector<128x128xf32> -> vector<128x128xf32>
    %59 = arith.addf %53, %58 : vector<128x128xf32>
    %c0_31 = arith.constant 0 : index
    %c0_32 = arith.constant 0 : index
    %60 = vector.load %arg4[%c0_31, %c0_32] : memref<1x128xf32, #tpu.memory_space<vmem>>, vector<1x128xf32>
    %61 = vector.broadcast %60 : vector<1x128xf32> to vector<128x128xf32>
    %62 = arith.addf %59, %61 : vector<128x128xf32>
    %cst_33 = arith.constant 0.000000e+00 : f32
    %63 = vector.broadcast %cst_33 : f32 to vector<128x128xf32>
    %64 = arith.maximumf %62, %63 : vector<128x128xf32>
    %65 = arith.truncf %64 : vector<128x128xf32> to vector<128x128xbf16>
    %c0_34 = arith.constant 0 : index
    %c0_35 = arith.constant 0 : index
    %c0_36 = arith.constant 0 : index
    %66 = vector.load %arg5[%c0_34, %c0_35, %c0_36] : memref<1x128x128xbf16, #tpu.memory_space<vmem>>, vector<1x128x128xbf16>
    %67 = vector.shape_cast %66 : vector<1x128x128xbf16> to vector<128x128xbf16>
    %68 = vector.shape_cast %65 : vector<128x128xbf16> to vector<1x128x128xbf16>
    tpu.vector_store %arg5[%c0_34, %c0_35, %c0_36], %68 {strides = array<i32>} : memref<1x128x128xbf16, #tpu.memory_space<vmem>>, vector<1x128x128xbf16>,
    return
  }
  func.func @transform_0(%arg0: i32, %arg1: i32) -> (i32, i32, i32, i32) {
    %c0_i32 = arith.constant 0 : i32
    %c0_i32_0 = arith.constant 0 : i32
    %c0_i32_1 = arith.constant 0 : i32
    %c0_i32_2 = arith.constant 0 : i32
    return %arg0, %c0_i32, %c0_i32_0, %c0_i32_1 : i32, i32, i32, i32
  }
  func.func @transform_1(%arg0: i32, %arg1: i32) -> (i32, i32, i32) {
    %c0_i32 = arith.constant 0 : i32
    %c0_i32_0 = arith.constant 0 : i32
    %c0_i32_1 = arith.constant 0 : i32
    %c0_i32_2 = arith.constant 0 : i32
    return %c0_i32, %c0_i32_0, %c0_i32_1 : i32, i32, i32
  }
  func.func @transform_2(%arg0: i32, %arg1: i32) -> (i32, i32) {
    %c0_i32 = arith.constant 0 : i32
    %c0_i32_0 = arith.constant 0 : i32
    %c0_i32_1 = arith.constant 0 : i32
    return %c0_i32, %c0_i32_0 : i32, i32
  }
  func.func @transform_3(%arg0: i32, %arg1: i32) -> (i32, i32, i32) {
    %c0_i32 = arith.constant 0 : i32
    %c0_i32_0 = arith.constant 0 : i32
    return %arg0, %arg1, %c0_i32 : i32, i32, i32
  }
}

</mosaic_0001>

<bundles_post_ra>
// kernel: tile.8
= control target key start
LH: loop header
LB: loop body
LE: loop exit
PB: predicated region body
PF: predicated region fallthrough
CT: control target
= control target key end

     0   :  { %s28_s0 = inlined_call_operand.vmem [shape: f32[8], index: 0, kind: input, shape index: {}]   ;;  %s29_s1 = inlined_call_operand.vmem [shape: f32[16,8], index: 1, kind: output, shape index: {}]  }
   0x1   :  { %v4_v0 = vld [vmem:[%s28_s0] ss:$0 sm:$0xff] }
   0x2   :  { %5 = vst [vmem:[%s29_s1] sm:$0xff] %v4_v0  ;;  %8 = vst [vmem:[%s29_s1 + $0x8] sm:$0xff] %v4_v0 }

// kernel: tile.9
= control target key start
LH: loop header
LB: loop body
LE: loop exit
PB: predicated region body
PF: predicated region fallthrough
CT: control target
= control target key end

     0   :  { %s131_s10 = smov 120   ;;  %s132_s11 = smov 104   ;;  %vm3_vm0 = vcmask 64512   ;;  %vm9_vm1 = vcmask 1048512   ;;  %vm15_vm2 = vcmask 982912   ;;  %vm21_vm3 = vcmask 917312   ;;  %s207_s0 = inlined_call_operand.vmem [shape: f32[16,8], index: 0, kind: input, shape index: {}]   ;;  %s208_s1 = inlined_call_operand.vmem [shape: f32[1,128], index: 1, kind: output, shape index: {}]  }
   0x1   :  { %v101_v0 = vld [vmem:[%s207_s0 + $0xf] sm:$0x1]   ;;  %v103_v1 = vld [vmem:[%s207_s0 + $0xd] sm:$0x1]   ;;  %v102_v2 = vld [vmem:[%s207_s0 + $0xe] sm:$0x1]  }
   0x2   :  { %7 = vrot.lane.b32.xlu0 %v101_v0, %s131_s10  ;;  %19 = vrot.lane.b32.xlu1 %v103_v1, %s132_s11  ;;  %v104_v3 = vld [vmem:[%s207_s0 + $0xc] sm:$0x1]   ;;  %s133_s16 = smov 112   ;;  %s134_s17 = smov 96   ;;  %v105_v4 = vld [vmem:[%s207_s0 + $0xb] sm:$0x1]  }
   0x3   :  { %v106_v5 = vld [vmem:[%s207_s0 + $0xa] sm:$0x1]   ;;  %v2_v6 = vld [vmem:[%s207_s0] sm:$0x1]   ;;  %s135_s24 = smov 88   ;;  %s136_s25 = smov 80  }
   0x4   :  { %4 = vst.msk [vmem:[#allocation0] sm:$0x1] %vm3_vm0, %v2_v6   ;;  %v107_v7 = vld [vmem:[%s207_s0 + $0x9] sm:$0x1]   ;;  %v108_v8 = vld [vmem:[%s207_s0 + $0x8] sm:$0x1]  }
   0x5   :  { %s137_s30 = smov 72   ;;  %s138_s2 = smov 64   ;;  %v109_v9 = vld [vmem:[%s207_s0 + $0x7] sm:$0x1]   ;;  %v110_v10 = vld [vmem:[%s207_s0 + $0x6] sm:$0x1]  }
   0x6   :  { %13 = vrot.lane.b32.xlu0 %v102_v2, %s133_s16  ;;  %25 = vrot.lane.b32.xlu1 %v104_v3, %s134_s17  ;;  %s139_s7 = smov 56   ;;  %s140_s8 = smov 48   ;;  %v111_v11 = vld [vmem:[%s207_s0 + $0x5] sm:$0x1]   ;;  %v112_v12 = vld [vmem:[%s207_s0 + $0x4] sm:$0x1]  }
   0x7   :  { %s141_s13 = smov 40   ;;  %s142_s14 = smov 32   ;;  %v113_v13 = vld [vmem:[%s207_s0 + $0x3] sm:$0x1]   ;;  %v114_v14 = vld [vmem:[%s207_s0 + $0x2] sm:$0x1]  }
   0x8   :  { %s143_s19 = smov 24   ;;  %s144_s20 = smov 16   ;;  %v115_v15 = vld [vmem:[%s207_s0 + $0x1] sm:$0x1]   ;;  %vm27_vm4 = vcmask 851712   ;;  %vm33_vm5 = vcmask 786112  }
   0x9   :  { %s145_s0 = smov 8   ;;  %vm39_vm6 = vcmask 720512   ;;  %vm45_vm7 = vcmask 654912   ;;  %vm51_vm8 = vcmask 589312   ;;  %vm57_vm9 = vcmask 523712  }
   0xa   :  { %31 = vrot.lane.b32.xlu0 %v105_v4, %s135_s24  ;;  %37 = vrot.lane.b32.xlu1 %v106_v5, %s136_s25  ;;  %vm63_vm10 = vcmask 458112   ;;  %vm69_vm11 = vcmask 392512   ;;  %vm75_vm12 = vcmask 326912   ;;  %vm81_vm13 = vcmask 261312  }
   0xb   :  { %vm87_vm14 = vcmask 195712   ;;  %vm93_vm15 = vcmask 130112  }
   0xe   :  { %43 = vrot.lane.b32.xlu0 %v107_v7, %s137_s30  ;;  %49 = vrot.lane.b32.xlu1 %v108_v8, %s138_s2 }
  0x12   :  { %55 = vrot.lane.b32.xlu0 %v109_v9, %s139_s7  ;;  %61 = vrot.lane.b32.xlu1 %v110_v10, %s140_s8 }
  0x16   :  { %67 = vrot.lane.b32.xlu0 %v111_v11, %s141_s13  ;;  %73 = vrot.lane.b32.xlu1 %v112_v12, %s142_s14 }
  0x1a   :  { %79 = vrot.lane.b32.xlu0 %v113_v13, %s143_s19  ;;  %85 = vrot.lane.b32.xlu1 %v114_v14, %s144_s20 }
  0x1e   :  { %91 = vrot.lane.b32.xlu0 %v115_v15, %s145_s0 }
  0x74   :  { %v8_v16 = vpop.permute.xlu0 %7   ;;  %v20_v17 = vpop.permute.xlu1 %19  }
  0x75   :  { %10 = vst.msk [vmem:[#allocation0] sm:$0x1] %vm9_vm1, %v8_v16  }
  0x78   :  { %v14_v18 = vpop.permute.xlu0 %13   ;;  %v26_v19 = vpop.permute.xlu1 %25  }
  0x79   :  { %16 = vst.msk [vmem:[#allocation0] sm:$0x1] %vm15_vm2, %v14_v18  }
  0x7a   :  { %22 = vst.msk [vmem:[#allocation0] sm:$0x1] %vm21_vm3, %v20_v17  }
  0x7b   :  { %28 = vst.msk [vmem:[#allocation0] sm:$0x1] %vm27_vm4, %v26_v19  }
  0x7c   :  { %v32_v20 = vpop.permute.xlu0 %31   ;;  %v38_v21 = vpop.permute.xlu1 %37  }
  0x7d   :  { %34 = vst.msk [vmem:[#allocation0] sm:$0x1] %vm33_vm5, %v32_v20  }
  0x7e   :  { %40 = vst.msk [vmem:[#allocation0] sm:$0x1] %vm39_vm6, %v38_v21  }
  0x80   :  { %v44_v22 = vpop.permute.xlu0 %43   ;;  %v50_v23 = vpop.permute.xlu1 %49  }
  0x81   :  { %46 = vst.msk [vmem:[#allocation0] sm:$0x1] %vm45_vm7, %v44_v22  }
  0x82   :  { %52 = vst.msk [vmem:[#allocation0] sm:$0x1] %vm51_vm8, %v50_v23  }
  0x84   :  { %v56_v24 = vpop.permute.xlu0 %55   ;;  %v62_v25 = vpop.permute.xlu1 %61  }
  0x85   :  { %58 = vst.msk [vmem:[#allocation0] sm:$0x1] %vm57_vm9, %v56_v24  }
  0x86   :  { %64 = vst.msk [vmem:[#allocation0] sm:$0x1] %vm63_vm10, %v62_v25  }
  0x88   :  { %v68_v26 = vpop.permute.xlu0 %67   ;;  %v74_v27 = vpop.permute.xlu1 %73  }
  0x89   :  { %70 = vst.msk [vmem:[#allocation0] sm:$0x1] %vm69_vm11, %v68_v26  }
  0x8a   :  { %76 = vst.msk [vmem:[#allocation0] sm:$0x1] %vm75_vm12, %v74_v27  }
  0x8c   :  { %v80_v28 = vpop.permute.xlu0 %79   ;;  %v86_v29 = vpop.permute.xlu1 %85  }
  0x8d   :  { %82 = vst.msk [vmem:[#allocation0] sm:$0x1] %vm81_vm13, %v80_v28  }
  0x8e   :  { %88 = vst.msk [vmem:[#allocation0] sm:$0x1] %vm87_vm14, %v86_v29  }
  0x90   :  { %v92_v30 = vpop.permute.xlu0 %91  }
  0x91   :  { %94 = vst.msk [vmem:[#allocation0] sm:$0x1] %vm93_vm15, %v92_v30  }
  0x98   :  { %v98_v31 = vld [vmem:[#allocation0] sm:$0x1] }
  0x99   :  { %100 = vst [vmem:[%s208_s1] sm:$0x1] %v98_v31 }

// kernel: conv_bn_relu_3d.1
= control target key start
LH: loop header
LB: loop body
LE: loop exit
PB: predicated region body
PF: predicated region fallthrough
CT: control target
= control target key end

     0   :  { %s3240_s12 = smov 0   ;;  %s3242_s13 = smov 0   ;;  %s3962_s0 = inlined_call_operand.vmem [shape: bf16[2,10,18,72], index: 0, kind: input, shape index: {}]   ;;  %s3963_s1 = inlined_call_operand.vmem [shape: bf16[9,72,128], index: 1, kind: input, shape index: {}]   ;;  %s3964_s2 = inlined_call_operand.vmem [shape: f32[1,128], index: 2, kind: input, shape index: {}]   ;;  %s3965_s3 = inlined_call_operand.vmem [shape: bf16[2,128,128], index: 3, kind: output, shape index: {}]  }
   0x1   :  { %s3244_s14 = smov 0  }
   0x2 LB: > { %s25_s15 = sadd.s32 1, %s3214_s13  ;;  %p2301_p0 = scmp.ge.s32.totalorder %s3218_s14, 1  ;;  %s3218_s14 = sphi %s3244_s14, %s13_s14   ;;  %s3214_s13 = sphi %s3242_s13, %s3971_s13   ;;  %s3210_s12 = sphi %s3240_s12, %s3970_s12  }
   0x3   : > { %p27_p1 = scmp.ge.s32.totalorder %s25_s15, 2  ;;  %p151_p2 = scmp.lt.s32.totalorder %s3218_s14, 3 }
   0x5   : > { %s3973_s15 = smov (%p27_p1, %s25_s15), 0  ;;  %p152_p3 = pnand %p2301_p0, %p151_p2 }
   0x6   : > { %v3141_v0 = vld [vmem:[%s3963_s1 + $0x6c] sm:$0xff] (!%p152_p3)   ;;  %p179_p4 = scmp.lt.s32.totalorder (!%p152_p3), %s3210_s12, 1  ;;  %v3143_v2 = vld [vmem:[%s3963_s1 + $0x74] sm:$0xff] (!%p152_p3)   ;;  %vm336_vm0 = vcmask (!%p152_p3), 1043456   ;;  %v3145_v4 = vld [vmem:[%s3963_s1 + $0x7c] sm:$0xff] (!%p152_p3)   ;;  %vm311_vm1 = vcmask (!%p152_p3), 588800  }
   0x7   : > { %155 = sbr.rel (%p152_p3) target bundleno = 399 (0x18f), region = 32  ;;  %v3142_v1 = vld [vmem:[%s3963_s1 + $0x90] sm:$0xff] (!%p152_p3)   ;;  %2734 = vmatprep.subr.bf16.mxu1 (!%p152_p3), %v3141_v0  ;;  %v3144_v3 = vld [vmem:[%s3963_s1 + $0x98] sm:$0xff] (!%p152_p3)   ;;  %v3146_v5 = vld [vmem:[%s3963_s1 + $0xa0] sm:$0xff] (!%p152_p3)   ;;  %vm1503_vm2 = vcmask (!%p152_p3), 1042432   ;;  %vm1504_vm3 = vcmask (!%p152_p3), 1046532  }
   0x8   : > { %2838 = vmatprep.subr.bf16.mxu0 (!%p152_p3), %v3142_v1  ;;  %2735 = vmatpush3.bf16.msra.mxu1 (!%p152_p3), %v3141_v0  ;;  %v3147_v6 = vld [vmem:[%s3963_s1 + $0x84] sm:$0xff] (!%p152_p3)   ;;  %v3149_v8 = vld [vmem:[%s3963_s1 + $0x8c] ss:$0 sps:$4 sm:$0xff] (!%p152_p3)   ;;  %v3150_v9 = vld [vmem:[%s3963_s1 + $0xb0] ss:$0 sps:$4 sm:$0xff] (!%p152_p3)  }
   0x9   : > { %2839 = vmatpush3.bf16.msra.mxu0 (!%p152_p3), %v3142_v1  ;;  %2736 = vmatprep.subr.bf16.mxu1 (!%p152_p3), %v3143_v2  ;;  %v3148_v7 = vld [vmem:[%s3963_s1 + $0xa8] sm:$0xff] (!%p152_p3)   ;;  %v338_v12 = vsel (!%p152_p3), %vm336_vm0, %v3149_v8, 0  ;;  %vm3302_vm4 = vmor (!%p152_p3), %vm1503_vm2, %vm1504_vm3  ;;  %v1197_v18 = vsel (!%p152_p3), %vm336_vm0, %v3150_v9, 0  ;;  %vm733_vm5 = vsmask.f32 (!%p152_p3), 3328  ;;  %v3153_v34 = vld [vmem:[%s3963_s1] sm:$0xff] (!%p152_p3)  }
   0xa   : > { %2840 = vmatprep.subr.bf16.mxu0 (!%p152_p3), %v3144_v3  ;;  %vm734_vm6 = vsmask.f32 (!%p152_p3), 7440  ;;  %v3344_v45 = vld [vmem:[%s3963_s1 + $0xfc] sm:$0xff] (!%p152_p3)   ;;  %v3156_v0 = vld [vmem:[%s3963_s1 + $0x8] sm:$0xff] (!%p152_p3)   ;;  %v3184_v16 = vld [vmem:[%s3963_s1 + $0x34] sm:$0xff] (!%p152_p3)  }
   0xb   : > { %vm3327_vm7 = vmor (!%p152_p3), %vm733_vm5, %vm734_vm6  ;;  %v3182_v35 = vld [vmem:[%s3963_s1 + $0x2c] sm:$0xff] (!%p152_p3)  }
   0xc   : > { %2737 = vmatpush3.bf16.msra.mxu1 (!%p152_p3), %v3143_v2 }
   0xd   : > { %2841 = vmatpush3.bf16.msra.mxu0 (!%p152_p3), %v3144_v3  ;;  %2738 = vmatprep.subr.bf16.mxu1 (!%p152_p3), %v3145_v4 }
   0xe   : > { %s3975_s12 = smov (!%p179_p4, %s3210_s12), 1  ;;  %2842 = vmatprep.subr.bf16.mxu0 %v3146_v5 }
   0xf   : > { %s3116_s28 = smul.u32 120, %s3975_s12  ;;  %s2553_s21 = sshll.u32 %s3975_s12, 6 }
  0x10   : > { %2739 = vmatpush3.bf16.msra.mxu1 %v3145_v4  ;;  %s3924_s24 = scalar_lea.vmem %s3965_s3, %s2553_s21 }
  0x11   : > { %s3288_s8 = scalar_lea.vmem %s3962_s0, %s3116_s28  ;;  %2843 = vmatpush3.bf16.msra.mxu0 %v3146_v5  ;;  %2740 = vmatprep.subr.bf16.mxu1 %v3147_v6 }
  0x12   : > { %v198_v10 = vld [vmem:[%s3288_s8 + $0xc] sm:$0xf]  ;;  %v199_v11 = vld [vmem:[%s3288_s8 + $0x10] sm:$0xf]  ;;  %v200_v17 = vld [vmem:[%s3288_s8 + $0x14] sm:$0x1]  ;;  %2844 = vmatprep.subr.bf16.mxu0 %v3148_v7 }
  0x13   : > { %v3299_v13 = vcombine.low %v198_v10, %v199_v11  ;;  %v761_v14 = vshrl.u32 %v198_v10, 16  ;;  %v764_v15 = vshll.u32 %v198_v10, 16  ;;  %v774_v19 = vshrl.u32 %v199_v11, 16  ;;  %v3309_v22 = vld [vmem:[%s3288_s8 + $0x18] sm:$0xf] }
  0x14   : > { %v2449_v20 = vrot.slane %v198_v10, 9  ;;  %v1515_v21 = vrot.slane %v199_v11, 5  ;;  %v770_v27 = vshll.u32 %v199_v11, 16  ;;  %v3316_v29 = vld [vmem:[%s3288_s8 + $0x1c] sm:$0xf]  ;;  %v780_v31 = vshll.u32 %v200_v17, 16  ;;  %2741 = vmatpush3.bf16.msra.mxu1 %v3147_v6 }
  0x15   : > { %v763_v23 = vrot.slane %v761_v14, 4  ;;  %v766_v24 = vrot.slane %v764_v15, 5  ;;  %2744 = vmatprep.mubr.msk.bf16.mxu1 %vm311_vm1, %v3299_v13  ;;  %v776_v28 = vrot.slane %v774_v19, 4  ;;  %v1518_v32 = vrot.slane %v200_v17, 5  ;;  %v3335_v40 = vld [vmem:[%s3288_s8 + $0x20] sm:$0x1]  ;;  %2845 = vmatpush3.bf16.msra.mxu0 %v3148_v7 }
  0x16   : > { %v1516_v25 = vsel %vm3302_vm4, %v2449_v20, %v1515_v21  ;;  %v1517_v26 = vrot.slane %v1515_v21, 4  ;;  %v3320_v33 = vcombine.low %v3309_v22, %v3316_v29  ;;  %v772_v36 = vrot.slane %v770_v27, 5  ;;  %3106 = vmatprep.subr.msk.bf16.mxu1 %vm336_vm0, %v3149_v8  ;;  %3110 = vmatprep.subr.msk.bf16.mxu0 %vm336_vm0, %v3150_v9  ;;  %v3350_v50 = vld [vmem:[%s3288_s8 + $0x24] sm:$0xf]  ;;  %v3356_v55 = vld [vmem:[%s3288_s8 + $0x28] sm:$0xf] }
  0x17   : > { %v767_v30 = vor.u32 %v766_v24, %v763_v23  ;;  %v785_v37 = vshrl.u32 %v3309_v22, 16  ;;  %v788_v38 = vshll.u32 %v3309_v22, 16  ;;  %v798_v39 = vshrl.u32 %v3316_v29, 16  ;;  %v3369_v1 = vld [vmem:[%s3288_s8 + $0x2c] sm:$0x1]  ;;  %v3157_v14 = vld [vmem:[%s3963_s1 + $0x104] sm:$0xff]  }
  0x18   : > { %v782_v42 = vrot.slane %v780_v31, 5  ;;  %v1519_v43 = vsel %vm3302_vm4, %v1517_v26, %v1518_v32  ;;  %v794_v44 = vshll.u32 %v3316_v29, 16  ;;  %v777_v46 = vor.u32 %v776_v28, %v772_v36  ;;  %2743 = vmatpush3.bf16.msra.mxu1 %v338_v12  ;;  %v3388_v15 = vld [vmem:[%s3288_s8 + $0x30] sm:$0xf]  ;;  %v3391_v17 = vld [vmem:[%s3288_s8 + $0x34] sm:$0xf] }
  0x19   : > { %v768_v41 = vrot.slane %v767_v30, 4  ;;  %v3347_v47 = vcombine.low %v1516_v25, %v1519_v43  ;;  %v787_v48 = vrot.slane %v785_v37, 4  ;;  %v790_v49 = vrot.slane %v788_v38, 5  ;;  %2847 = vmatpush3.bf16.msra.mxu0 %v1197_v18  ;;  %2760 = vmatprep.subr.bf16.mxu1 %v3153_v34  ;;  %v3403_v23 = vld [vmem:[%s3288_s8 + $0x38] sm:$0x1]  ;;  %v3159_v24 = vld [vmem:[%s3963_s1 + $0x10] sm:$0xff]  }
  0x1a   : > { %v796_v52 = vrot.slane %v794_v44, 5  ;;  %v800_v53 = vrot.slane %v798_v39, 4  ;;  %v804_v54 = vshll.u32 %v3335_v40, 16  ;;  %v778_v56 = vrot.slane %v777_v46, 4  ;;  %2864 = vmatprep.subr.bf16.mxu0 %v3344_v45  ;;  %v3417_v39 = vld [vmem:[%s3288_s8 + $0x3c] sm:$0xf] }
  0x1b   : > { %v773_v51 = vsel %vm3327_vm7, %v768_v41, %v772_v36  ;;  %v791_v57 = vor.u32 %v790_v49, %v787_v48  ;;  %v3360_v58 = vcombine.low %v3350_v50, %v3356_v55  ;;  %v809_v59 = vshrl.u32 %v3350_v50, 16  ;;  %2745 = vmatmul.mubr.msk.bf16.vlgmr.msra.gmra.mrb[0].mxu1 %vm311_vm1, %v3320_v33  ;;  %v3423_v44 = vld [vmem:[%s3288_s8 + $0x40] sm:$0xf] }
  0x1c   : > { %v801_v60 = vor.u32 %v800_v53, %v796_v52  ;;  %v806_v61 = vrot.slane %v804_v54, 5  ;;  %v812_v62 = vshll.u32 %v3350_v50, 16  ;;  %v822_v63 = vshrl.u32 %v3356_v55, 16  ;;  %2761 = vmatpush3.bf16.msra.mxu1 %v3153_v34  ;;  %v3436_v53 = vld [vmem:[%s3288_s8 + $0x44] sm:$0x1]  ;;  %v3163_v54 = vld [vmem:[%s3963_s1 + $0x18] sm:$0xff]  }
  0x1d   : > { %v783_v2 = vsel %vm3327_vm7, %v778_v56, %v782_v42  ;;  %v792_v3 = vrot.slane %v791_v57, 4  ;;  %v811_v4 = vrot.slane %v809_v59, 4  ;;  %v818_v5 = vshll.u32 %v3356_v55, 16  ;;  %2748 = vmatprep.mubr.msk.bf16.mxu1 %vm311_vm1, %v3360_v58  ;;  %2762 = vmatprep.subr.bf16.mxu1 %v3156_v0 }
  0x1e   : > { %v3375_v6 = vcombine.low %v773_v51, %v783_v2  ;;  %v802_v7 = vrot.slane %v801_v60, 4  ;;  %v814_v8 = vrot.slane %v812_v62, 5  ;;  %v824_v9 = vrot.slane %v822_v63, 4  ;;  %v3451_v62 = vld [vmem:[%s3288_s8 + $0x4c] sm:$0xf] }
  0x1f   : > { %v797_v10 = vsel %vm3327_vm7, %v792_v3, %v796_v52  ;;  %v820_v11 = vrot.slane %v818_v5, 5  ;;  %v828_v12 = vshll.u32 %v3369_v1, 16  ;;  %v3399_v20 = vcombine.low %v3388_v15, %v3391_v17 }
  0x20   : > { %2848 = vmatprep.mubr.msk.bf16.mxu0 %vm311_vm1, %v3375_v6  ;;  %v807_v18 = vsel %vm3327_vm7, %v802_v7, %v806_v61  ;;  %v815_v19 = vor.u32 %v814_v8, %v811_v4  ;;  %v833_v21 = vshrl.u32 %v3388_v15, 16  ;;  %v836_v28 = vshll.u32 %v3388_v15, 16  ;;  %2763 = vmatpush3.bf16.msra.mxu1 %v3156_v0  ;;  %v3448_v61 = vld [vmem:[%s3288_s8 + $0x48] sm:$0xf]  ;;  %v3458_v4 = vld [vmem:[%s3288_s8 + $0x50] sm:$0x1] }
  0x21   : > { %v3408_v25 = vcombine.low %v797_v10, %v807_v18  ;;  %v825_v26 = vor.u32 %v824_v9, %v820_v11  ;;  %v830_v27 = vrot.slane %v828_v12, 5  ;;  %v846_v31 = vshrl.u32 %v3391_v17, 16  ;;  %2764 = vmatprep.subr.bf16.mxu1 %v3159_v24 }
  0x22   : > { %v816_v30 = vrot.slane %v815_v19, 4  ;;  %v835_v32 = vrot.slane %v833_v21, 4  ;;  %v842_v34 = vshll.u32 %v3391_v17, 16  ;;  %v838_v37 = vrot.slane %v836_v28, 5 }
  0x23   : > { %2849 = vmatmul.mubr.msk.bf16.vlgmr.msra.gmra.mrb[0].mxu0 %vm311_vm1, %v3408_v25  ;;  %v826_v36 = vrot.slane %v825_v26, 4  ;;  %v852_v38 = vshll.u32 %v3403_v23, 16  ;;  %v848_v43 = vrot.slane %v846_v31, 4  ;;  %v857_v46 = vshrl.u32 %v3417_v39, 16  ;;  %2749 = vmatmul.mubr.msk.bf16.gmra.mrb[4].mxu1 %vm311_vm1, %v3399_v20 }
  0x24   : > { %2865 = vmatpush3.bf16.msra.mxu0 %v3344_v45  ;;  %v821_v41 = vsel %vm3327_vm7, %v816_v30, %v820_v11  ;;  %v844_v42 = vrot.slane %v842_v34, 5  ;;  %v839_v49 = vor.u32 %v838_v37, %v835_v32  ;;  %v3160_v45 = vld [vmem:[%s3963_s1 + $0x10c] sm:$0xff]   ;;  %v3433_v52 = vcombine.low %v3417_v39, %v3423_v44  ;;  %2765 = vmatpush3.bf16.msra.mxu1 %v3159_v24  ;;  %v3483_v34 = vld [vmem:[%s3288_s8 + $0x58] sm:$0xf] }
  0x25   : > { %v831_v48 = vsel %vm3327_vm7, %v826_v36, %v830_v27  ;;  %2866 = vmatprep.subr.bf16.mxu0 %v3157_v14  ;;  %v854_v51 = vrot.slane %v852_v38, 5  ;;  %v860_v59 = vshll.u32 %v3417_v39, 16  ;;  %v870_v60 = vshrl.u32 %v3423_v44, 16  ;;  %2766 = vmatprep.subr.bf16.mxu1 %v3163_v54  ;;  %v3477_v27 = vld [vmem:[%s3288_s8 + $0x54] sm:$0xf] }
  0x26   : > { %v3441_v56 = vcombine.low %v821_v41, %v831_v48  ;;  %v849_v57 = vor.u32 %v848_v43, %v844_v42  ;;  %v840_v63 = vrot.slane %v839_v49, 4  ;;  %2752 = vmatprep.mubr.msk.bf16.mxu1 %vm311_vm1, %v3433_v52  ;;  %v859_v0 = vrot.slane %v857_v46, 4 }
  0x27   : > { %v866_v2 = vshll.u32 %v3423_v44, 16  ;;  %v876_v3 = vshll.u32 %v3436_v53, 16  ;;  %v862_v7 = vrot.slane %v860_v59, 5  ;;  %v872_v8 = vrot.slane %v870_v60, 4  ;;  %v3505_v60 = vld [vmem:[%s3288_s8 + $0x64] sm:$0xf] }
  0x28   : > { %2852 = vmatprep.mubr.msk.bf16.mxu0 %vm311_vm1, %v3441_v56  ;;  %v850_v5 = vrot.slane %v849_v57, 4  ;;  %2867 = vmatpush3.bf16.msra.mxu0 %v3157_v14  ;;  %v3464_v9 = vcombine.low %v3448_v61, %v3451_v62  ;;  %v845_v10 = vsel %vm3327_vm7, %v840_v63, %v844_v42  ;;  %v881_v18 = vshrl.u32 %v3448_v61, 16  ;;  %v3164_v14 = vld [vmem:[%s3963_s1 + $0x114] sm:$0xff]   ;;  %v3487_v42 = vld [vmem:[%s3288_s8 + $0x5c] sm:$0x1] }
  0x29   : > { %2868 = vmatprep.subr.bf16.mxu0 %v3160_v45  ;;  %v868_v11 = vrot.slane %v866_v2, 5  ;;  %v878_v12 = vrot.slane %v876_v3, 5  ;;  %v863_v21 = vor.u32 %v862_v7, %v859_v0  ;;  %v884_v24 = vshll.u32 %v3448_v61, 16  ;;  %2767 = vmatpush3.bf16.msra.mxu1 %v3163_v54 }
  0x2a   : > { %v855_v19 = vsel %vm3327_vm7, %v850_v5, %v854_v51  ;;  %v894_v26 = vshrl.u32 %v3451_v62, 16  ;;  %v883_v31 = vrot.slane %v881_v18, 4  ;;  %v890_v32 = vshll.u32 %v3451_v62, 16  ;;  %v3497_v51 = vld [vmem:[%s3288_s8 + $0x60] sm:$0xf] }
  0x2b   : > { %v3479_v28 = vcombine.low %v845_v10, %v855_v19  ;;  %v873_v30 = vor.u32 %v872_v8, %v868_v11  ;;  %v864_v36 = vrot.slane %v863_v21, 4  ;;  %v886_v37 = vrot.slane %v884_v24, 5  ;;  %2753 = vmatmul.mubr.msk.bf16.gmra.mrb[8].mxu1 %vm311_vm1, %v3464_v9  ;;  %v3167_v5 = vld [vmem:[%s3963_s1 + $0x20] ss:$0 sps:$4 sm:$0xff]  }
  0x2c   : > { %2869 = vmatpush3.bf16.msra.mxu0 %v3160_v45  ;;  %v896_v38 = vrot.slane %v894_v26, 4  ;;  %v900_v41 = vshll.u32 %v3458_v4, 16  ;;  %v892_v46 = vrot.slane %v890_v32, 5  ;;  %v3493_v48 = vcombine.low %v3477_v27, %v3483_v34  ;;  %v3527_v26 = vld [vmem:[%s3288_s8 + $0x68] sm:$0x1]  ;;  %3107 = vmatprep.subr.msk.bf16.mxu1 %vm336_vm0, %v3167_v5 }
  0x2d   : > { %2853 = vmatmul.mubr.msk.bf16.gmra.mrb[4].mxu0 %vm311_vm1, %v3479_v28  ;;  %v874_v43 = vrot.slane %v873_v30, 4  ;;  %2870 = vmatprep.subr.bf16.mxu0 %v3164_v14  ;;  %v905_v49 = vshrl.u32 %v3477_v27, 16  ;;  %v869_v45 = vsel %vm3327_vm7, %v864_v36, %v868_v11  ;;  %v887_v54 = vor.u32 %v886_v37, %v883_v31  ;;  %v3537_v36 = vld [vmem:[%s3288_s8] sm:$0xf]  ;;  %v3540_v37 = vld [vmem:[%s3288_s8 + $0x4] sm:$0xf] }
  0x2e   : > { %v902_v57 = vrot.slane %v900_v41, 5  ;;  %v908_v59 = vshll.u32 %v3477_v27, 16  ;;  %v897_v0 = vor.u32 %v896_v38, %v892_v46  ;;  %2756 = vmatprep.mubr.msk.bf16.mxu1 %vm311_vm1, %v3493_v48  ;;  %v918_v2 = vshrl.u32 %v3483_v34, 16  ;;  %v3170_v38 = vld [vmem:[%s3963_s1 + $0xd8] sm:$0xff]  }
  0x2f   : > { %v879_v63 = vsel %vm3327_vm7, %v874_v43, %v878_v12  ;;  %v907_v3 = vrot.slane %v905_v49, 4  ;;  %v888_v8 = vrot.slane %v887_v54, 4  ;;  %v914_v11 = vshll.u32 %v3483_v34, 16  ;;  %v3168_v12 = vld [vmem:[%s3963_s1 + $0x11c] ss:$0 sps:$4 sm:$0xff]  }
  0x30   : > { %v3515_v7 = vcombine.low %v869_v45, %v879_v63  ;;  %2871 = vmatpush3.bf16.msra.mxu0 %v3164_v14  ;;  %v910_v10 = vrot.slane %v908_v59, 5  ;;  %v898_v18 = vrot.slane %v897_v0, 4  ;;  %v920_v19 = vrot.slane %v918_v2, 4  ;;  %v3552_v45 = vld [vmem:[%s3963_s1 + $0x48] sm:$0xff]  }
  0x31   : > { %v924_v21 = vshll.u32 %v3487_v42, 16  ;;  %v3524_v24 = vcombine.low %v3497_v51, %v3505_v60  ;;  %v893_v14 = vsel %vm3327_vm7, %v888_v8, %v892_v46  ;;  %v916_v31 = vrot.slane %v914_v11, 5  ;;  %3111 = vmatprep.subr.msk.bf16.mxu0 %vm336_vm0, %v3168_v12 }
  0x32   : > { %2856 = vmatprep.mubr.msk.bf16.mxu0 %vm311_vm1, %v3515_v7  ;;  %v911_v30 = vor.u32 %v910_v10, %v907_v3  ;;  %v1130_v32 = vshrl.u32 %v3497_v51, 16  ;;  %v903_v41 = vsel %vm3327_vm7, %v898_v18, %v902_v57  ;;  %v1133_v46 = vshll.u32 %v3497_v51, 16 }
  0x33   : > { %v926_v43 = vrot.slane %v924_v21, 5  ;;  %v1143_v49 = vshrl.u32 %v3505_v60, 16  ;;  %v3554_v54 = vcombine.low %v893_v14, %v903_v41  ;;  %v921_v63 = vor.u32 %v920_v19, %v916_v31  ;;  %2757 = vmatmul.mubr.msk.bf16.gmra.mrb[12].mxu1 %vm311_vm1, %v3524_v24 }
  0x34   : > { %v912_v59 = vrot.slane %v911_v30, 4  ;;  %v1132_v0 = vrot.slane %v1130_v32, 4  ;;  %v1135_v2 = vrot.slane %v1133_v46, 5  ;;  %v1139_v3 = vshll.u32 %v3505_v60, 16 }
  0x35   : > { %v1145_v8 = vrot.slane %v1143_v49, 4  ;;  %v1149_v57 = vshll.u32 %v3527_v26, 16  ;;  %2857 = vmatmul.mubr.msk.bf16.gmra.mrb[8].mxu0 %vm311_vm1, %v3554_v54  ;;  %v922_v11 = vrot.slane %v921_v63, 4  ;;  %v473_v18 = vsel %vm336_vm0, %v3167_v5, 0  ;;  %v3585_v63 = vld [vmem:[%s3288_s8 + $0x70] sm:$0xf] }
  0x36   : > { %v917_v10 = vsel %vm3327_vm7, %v912_v59, %v916_v31  ;;  %v1380_v19 = vsel %vm336_vm0, %v3168_v12, 0  ;;  %v1136_v21 = vor.u32 %v1135_v2, %v1132_v0  ;;  %v1141_v14 = vrot.slane %v1139_v3, 5  ;;  %2769 = vmatpush3.bf16.msra.mxu1 %v473_v18  ;;  %v3582_v59 = vld [vmem:[%s3288_s8 + $0x6c] sm:$0xf]  ;;  %v3588_v0 = vld [vmem:[%s3288_s8 + $0x74] sm:$0x1] }
  0x37   : > { %2873 = vmatpush3.bf16.msra.mxu0 %v1380_v19  ;;  %v2335_v30 = vcombine.low %v3537_v36, %v3540_v37  ;;  %v927_v31 = vsel %vm3327_vm7, %v922_v11, %v926_v43  ;;  %2786 = vmatprep.subr.bf16.mxu1 %v3170_v38  ;;  %v1151_v41 = vrot.slane %v1149_v57, 5  ;;  %v3172_v43 = vld [vmem:[%s3963_s1 + $0xe0] sm:$0xff]   ;;  %v1313_v3 = vshrl.u32 %v3582_v59, 16 }
  0x38   : > { %2890 = vmatprep.subr.bf16.mxu0 %v3552_v45  ;;  %v3571_v32 = vcombine.low %v917_v10, %v927_v31  ;;  %v1137_v5 = vrot.slane %v1136_v21, 4  ;;  %v1146_v12 = vor.u32 %v1145_v8, %v1141_v14  ;;  %v1316_v8 = vshll.u32 %v3582_v59, 16 }
  0x39   : > { %2770 = vmatprep.mubr.msk.bf16.mxu1 %vm311_vm1, %v2335_v30  ;;  %v1322_v57 = vshll.u32 %v3585_v63, 16  ;;  %v1326_v11 = vshrl.u32 %v3585_v63, 16  ;;  %v1332_v18 = vshll.u32 %v3588_v0, 16  ;;  %v1315_v19 = vrot.slane %v1313_v3, 4 }
  0x3a   : > { %2860 = vmatprep.mubr.msk.bf16.mxu0 %vm311_vm1, %v3571_v32  ;;  %v1142_v46 = vsel %vm3327_vm7, %v1137_v5, %v1141_v14  ;;  %v1147_v49 = vrot.slane %v1146_v12, 4  ;;  %v1318_v21 = vrot.slane %v1316_v8, 5  ;;  %v737_v30 = vshrl.u32 %v3537_v36, 16 }
  0x3b   : > { %2771 = vmatmul.mubr.msk.bf16.vlgmr.msra.gmra.mrb[0].mxu1 %vm311_vm1, %v3299_v13  ;;  %v1324_v14 = vrot.slane %v1322_v57, 5  ;;  %v740_v31 = vshll.u32 %v3537_v36, 16  ;;  %v3174_v13 = vld [vmem:[%s3963_s1 + $0xe8] sm:$0xff]   ;;  %v1328_v5 = vrot.slane %v1326_v11, 4  ;;  %v750_v3 = vshrl.u32 %v3540_v37, 16 }
  0x3c   : > { %v1152_v2 = vsel %vm3327_vm7, %v1147_v49, %v1151_v41  ;;  %2787 = vmatpush3.bf16.msra.mxu1 %v3170_v38  ;;  %2774 = vmatprep.mubr.msk.bf16.mxu1 %vm311_vm1, %v3320_v33  ;;  %v3178_v38 = vld [vmem:[%s3963_s1 + $0xf8] ss:$0 sps:$4 sm:$0xff]   ;;  %v1319_v12 = vor.u32 %v1318_v21, %v1315_v19  ;;  %v1334_v41 = vrot.slane %v1332_v18, 5  ;;  %v3176_v49 = vld [vmem:[%s3963_s1 + $0xf0] sm:$0xff]   ;;  %v1522_v57 = vrot.slane %v3316_v29, 5 }
  0x3d   : > { %v3595_v10 = vcombine.low %v1142_v46, %v1152_v2  ;;  %2788 = vmatprep.subr.bf16.mxu1 %v3172_v43  ;;  %v2450_v46 = vrot.slane %v3309_v22, 9  ;;  %v1329_v2 = vor.u32 %v1328_v5, %v1324_v14  ;;  %v1525_v11 = vrot.slane %v3335_v40, 5  ;;  %v3173_v19 = vld [vmem:[%s3963_s1 + $0x50] sm:$0xff]  }
  0x3e   : > { %v1320_v8 = vrot.slane %v1319_v12, 4  ;;  %v2451_v22 = vrot.slane %v3350_v50, 9  ;;  %v1529_v12 = vrot.slane %v3356_v55, 5  ;;  %v618_v40 = vsel %vm336_vm0, %v3178_v38, 0 }
  0x3f   : > { %2861 = vmatmul.mubr.msk.bf16.gmra.mrb[12].mxu0 %vm311_vm1, %v3595_v10  ;;  %v1330_v18 = vrot.slane %v1329_v2, 4  ;;  %v1523_v5 = vsel %vm3302_vm4, %v2450_v46, %v1522_v57  ;;  %v1532_v2 = vrot.slane %v3369_v1, 5  ;;  %v2452_v1 = vrot.slane %v3388_v15, 9  ;;  %v3175_v15 = vld [vmem:[%s3963_s1 + $0x58] sm:$0xff]  }
  0x40   : > { %2874 = vmatprep.mubr.msk.bf16.mxu0 %vm311_vm1, %v3408_v25  ;;  %2789 = vmatpush3.bf16.msra.mxu1 %v3172_v43  ;;  %v1325_v21 = vsel %vm3327_vm7, %v1320_v8, %v1324_v14  ;;  %v1524_v43 = vrot.slane %v1522_v57, 4  ;;  %v1530_v55 = vsel %vm3302_vm4, %v2451_v22, %v1529_v12  ;;  %v1531_v46 = vrot.slane %v1529_v12, 4 }
  0x41   : > { %2790 = vmatprep.subr.bf16.mxu1 %v3174_v13  ;;  %v1335_v29 = vsel %vm3327_vm7, %v1330_v18, %v1334_v41  ;;  %v1539_v8 = vrot.slane %v3403_v23, 5  ;;  %v1543_v18 = vrot.slane %v3423_v44, 5  ;;  %v1546_v22 = vrot.slane %v3436_v53, 5 }
  0x42   : > { %v3639_v50 = vcombine.low %v1325_v21, %v1335_v29  ;;  %v1526_v14 = vsel %vm3302_vm4, %v1524_v43, %v1525_v11  ;;  %v1533_v57 = vsel %vm3302_vm4, %v1531_v46, %v1532_v2  ;;  %v2453_v11 = vrot.slane %v3417_v39, 9  ;;  %v3676_v43 = vld [vmem:[%s3963_s1 + $0x24] sm:$0xff]  }
  0x43   : > { %2775 = vmatmul.mubr.msk.bf16.gmra.mrb[4].mxu1 %vm311_vm1, %v3360_v58  ;;  %v3647_v41 = vcombine.low %v1523_v5, %v1526_v14  ;;  %v2454_v21 = vrot.slane %v3448_v61, 9  ;;  %v1545_v44 = vrot.slane %v1543_v18, 4  ;;  %v1550_v53 = vrot.slane %v3451_v62, 5  ;;  %v3177_v62 = vld [vmem:[%s3963_s1 + $0x60] sm:$0xff]   ;;  %v197_v46 = vld [vmem:[%s3288_s8 + $0x8] sm:$0x1] }
  0x44   : > { %2791 = vmatpush3.bf16.msra.mxu1 %v3174_v13  ;;  %2778 = vmatprep.mubr.msk.bf16.mxu1 %vm311_vm1, %v3399_v20  ;;  %v1536_v13 = vrot.slane %v3391_v17, 5  ;;  %v3663_v17 = vcombine.low %v1530_v55, %v1533_v57  ;;  %v1544_v39 = vsel %vm3302_vm4, %v2453_v11, %v1543_v18  ;;  %v1553_v5 = vrot.slane %v3458_v4, 5  ;;  %v3179_v55 = vld [vmem:[%s3963_s1 + $0x68] ss:$0 sps:$4 sm:$0xff]  }
  0x45   : > { %2792 = vmatprep.subr.bf16.mxu1 %v3176_v49  ;;  %v2455_v61 = vrot.slane %v3477_v27, 9  ;;  %v1560_v29 = vrot.slane %v3487_v42, 5  ;;  %v1551_v2 = vsel %vm3302_vm4, %v2454_v21, %v1550_v53  ;;  %v1552_v14 = vrot.slane %v1550_v53, 4 }
  0x46   : > { %v1537_v23 = vsel %vm3302_vm4, %v2452_v1, %v1536_v13  ;;  %v1508_v27 = vrot.slane %v3540_v37, 5  ;;  %v746_v11 = vshll.u32 %v3540_v37, 16  ;;  %v752_v18 = vrot.slane %v750_v3, 4 }
  0x47   : > { %2875 = vmatmul.mubr.msk.bf16.vlgmr.msra.gmra.mrb[0].mxu0 %vm311_vm1, %v3441_v56  ;;  %v1554_v1 = vsel %vm3302_vm4, %v1552_v14, %v1553_v5  ;;  %v1766_v21 = vrot.slane %v3505_v60, 5  ;;  %v2448_v37 = vrot.slane %v3537_v36, 9  ;;  %v1936_v53 = vrot.slane %v3588_v0, 5 }
  0x48   : > { %2891 = vmatpush3.bf16.msra.mxu0 %v3552_v45  ;;  %2878 = vmatprep.mubr.msk.bf16.mxu0 %vm311_vm1, %v3479_v28  ;;  %v1538_v45 = vrot.slane %v1536_v13, 4  ;;  %v739_v13 = vrot.slane %v737_v30, 4  ;;  %v3714_v57 = vcombine.low %v1551_v2, %v1554_v1  ;;  %v1648_v60 = vsel %vm336_vm0, %v3179_v55, 0 }
  0x49   : > { %2892 = vmatprep.subr.bf16.mxu0 %v3173_v19  ;;  %2793 = vmatpush3.bf16.msra.mxu1 %v3176_v49  ;;  %v1557_v49 = vrot.slane %v3483_v34, 5  ;;  %v1511_v0 = vrot.slane %v197_v46, 5 }
  0x4a   : > { %3108 = vmatprep.subr.msk.bf16.mxu1 %vm336_vm0, %v3178_v38  ;;  %v1540_v12 = vsel %vm3302_vm4, %v1538_v45, %v1539_v8  ;;  %v1547_v38 = vsel %vm3302_vm4, %v1545_v44, %v1546_v22  ;;  %v742_v8 = vrot.slane %v740_v31, 5  ;;  %v756_v22 = vshll.u32 %v197_v46, 16 }
  0x4b   : > { %v3686_v4 = vcombine.low %v1537_v23, %v1540_v12  ;;  %2779 = vmatmul.mubr.msk.bf16.gmra.mrb[8].mxu1 %vm311_vm1, %v3433_v52  ;;  %v3695_v34 = vcombine.low %v1544_v39, %v1547_v38  ;;  %v1558_v42 = vsel %vm3302_vm4, %v2455_v61, %v1557_v49  ;;  %v2486_v23 = vrot.slane %v3497_v51, 9 }
  0x4c   : > { %2893 = vmatpush3.bf16.msra.mxu0 %v3173_v19  ;;  %v1559_v19 = vrot.slane %v1557_v49, 4  ;;  %2782 = vmatprep.mubr.msk.bf16.mxu1 %vm311_vm1, %v3464_v9  ;;  %v743_v31 = vor.u32 %v742_v8, %v739_v13  ;;  %v748_v45 = vrot.slane %v746_v11, 5  ;;  %v1769_v39 = vrot.slane %v3527_v26, 5 }
  0x4d   : > { %2894 = vmatprep.subr.bf16.mxu0 %v3175_v15  ;;  %2795 = vmatpush3.bf16.msra.mxu1 %v618_v40  ;;  %v2510_v44 = vrot.slane %v3582_v59, 9  ;;  %v758_v12 = vrot.slane %v756_v22, 5  ;;  %v1767_v51 = vsel %vm3302_vm4, %v2486_v23, %v1766_v21  ;;  %v1768_v61 = vrot.slane %v1766_v21, 4 }
  0x4e   : > { %2812 = vmatprep.subr.bf16.mxu1 %v3676_v43  ;;  %v1561_v40 = vsel %vm3302_vm4, %v1559_v19, %v1560_v29  ;;  %v744_v3 = vrot.slane %v743_v31, 4  ;;  %v753_v5 = vor.u32 %v752_v18, %v748_v45  ;;  %v1510_v49 = vrot.slane %v1508_v27, 4  ;;  %v3181_v29 = vld [vmem:[%s3963_s1 + $0xb4] sm:$0xff]  }
  0x4f   : > { %2879 = vmatmul.mubr.msk.bf16.gmra.mrb[4].mxu0 %vm311_vm1, %v3515_v7  ;;  %v3723_v30 = vcombine.low %v1558_v42, %v1561_v40  ;;  %v1770_v2 = vsel %vm3302_vm4, %v1768_v61, %v1769_v39  ;;  %v1509_v46 = vsel %vm3302_vm4, %v2448_v37, %v1508_v27  ;;  %v3190_v27 = vld [vmem:[%s3963_s1 + $0xd4] ss:$0 sps:$4 sm:$0xff]  }
  0x50   : > { %2895 = vmatpush3.bf16.msra.mxu0 %v3175_v15  ;;  %2882 = vmatprep.mubr.msk.bf16.mxu0 %vm311_vm1, %v3554_v54  ;;  %v1933_v15 = vrot.slane %v3585_v63, 5  ;;  %v754_v38 = vrot.slane %v753_v5, 4  ;;  %v3751_v14 = vcombine.low %v1767_v51, %v1770_v2  ;;  %v1512_v1 = vsel %vm3302_vm4, %v1510_v49, %v1511_v0 }
  0x51   : > { %2896 = vmatprep.subr.bf16.mxu0 %v3177_v62  ;;  %v2465_v13 = vcombine.low %v1509_v46, %v1512_v1 }
  0x52   : > { %v3737_v26 = vsel %vm3302_vm4, %v2510_v44, %v1933_v15  ;;  %v1935_v36 = vrot.slane %v1933_v15, 4  ;;  %v759_v19 = vsel %vm3327_vm7, %v754_v38, %v758_v12  ;;  %v3914_v15 = vld [vmem:[%s3964_s2] ss:$0 sm:$0xff] }
  0x53   : > { %2783 = vmatmul.mubr.msk.bf16.gmra.mrb[12].mxu1 %vm311_vm1, %v3493_v48 }
  0x54   : > { %2897 = vmatpush3.bf16.msra.mxu0 %v3177_v62  ;;  %v749_v62 = vsel %vm3327_vm7, %v744_v3, %v748_v45  ;;  %2796 = vmatprep.mubr.msk.bf16.mxu1 %vm311_vm1, %v3320_v33  ;;  %v3755_v42 = vsel %vm3302_vm4, %v1935_v36, %v1936_v53 }
  0x55   : > { %3112 = vmatprep.subr.msk.bf16.mxu0 %vm336_vm0, %v3179_v55  ;;  %v2520_v55 = vcombine.low %v3737_v26, %v3755_v42  ;;  %v2381_v33 = vcombine.low %v749_v62, %v759_v19 }
  0x57   : > { %2883 = vmatmul.mubr.msk.bf16.gmra.mrb[8].mxu0 %vm311_vm1, %v3571_v32 }
  0x58   : > { %2886 = vmatprep.mubr.msk.bf16.mxu0 %vm311_vm1, %v3595_v10  ;;  %2899 = vmatpush3.bf16.msra.mxu0 %v1648_v60  ;;  %v3189_v10 = vld [vmem:[%s3963_s1 + $0x44] ss:$0 sps:$4 sm:$0xff]  }
  0x59   : > { %2916 = vmatprep.subr.bf16.mxu0 %v3181_v29 }
  0x5b   : > { %2797 = vmatmul.mubr.msk.bf16.vlgmr.msra.gmra.mrb[0].mxu1 %vm311_vm1, %v3360_v58  ;;  %v3186_v58 = vld [vmem:[%s3963_s1 + $0x3c] sm:$0xff]  }
  0x5c   : > { %2813 = vmatpush3.bf16.msra.mxu1 %v3676_v43  ;;  %2800 = vmatprep.mubr.msk.bf16.mxu1 %vm311_vm1, %v3399_v20  ;;  %v3183_v20 = vld [vmem:[%s3963_s1 + $0xbc] sm:$0xff]   ;;  %v3187_v43 = vld [vmem:[%s3963_s1 + $0xcc] sm:$0xff]  }
  0x5d   : > { %2814 = vmatprep.subr.bf16.mxu1 %v3182_v35 }
  0x5f   : > { %2887 = vmatmul.mubr.msk.bf16.gmra.mrb[12].mxu0 %vm311_vm1, %v3639_v50  ;;  %v3191_v50 = vld [vmem:[%s3963_s1 + $0x120] sm:$0xff]  }
  0x60   : > { %2900 = vmatprep.mubr.msk.bf16.mxu0 %vm311_vm1, %v2465_v13  ;;  %2815 = vmatpush3.bf16.msra.mxu1 %v3182_v35 }
  0x61   : > { %2816 = vmatprep.subr.bf16.mxu1 %v3184_v16 }
  0x63   : > { %2801 = vmatmul.mubr.msk.bf16.gmra.mrb[4].mxu1 %vm311_vm1, %v3433_v52  ;;  %v3185_v52 = vld [vmem:[%s3963_s1 + $0xc4] sm:$0xff]  }
  0x64   : > { %2817 = vmatpush3.bf16.msra.mxu1 %v3184_v16  ;;  %2804 = vmatprep.mubr.msk.bf16.mxu1 %vm311_vm1, %v3464_v9  ;;  %v1014_v9 = vsel %vm336_vm0, %v3189_v10, 0 }
  0x65   : > { %2818 = vmatprep.subr.bf16.mxu1 %v3186_v58 }
  0x67   : > { %2901 = vmatmul.mubr.msk.bf16.vlgmr.msra.gmra.mrb[0].mxu0 %vm311_vm1, %v3347_v47 }
  0x68   : > { %2917 = vmatpush3.bf16.msra.mxu0 %v3181_v29  ;;  %2904 = vmatprep.mubr.msk.bf16.mxu0 %vm311_vm1, %v3647_v41 }
  0x69   : > { %2918 = vmatprep.subr.bf16.mxu0 %v3183_v20  ;;  %2819 = vmatpush3.bf16.msra.mxu1 %v3186_v58 }
  0x6a   : > { %3109 = vmatprep.subr.msk.bf16.mxu1 %vm336_vm0, %v3189_v10 }
  0x6b   : > { %2805 = vmatmul.mubr.msk.bf16.gmra.mrb[8].mxu1 %vm311_vm1, %v3493_v48  ;;  %v2358_v48 = vcombine.low %v3582_v59, %v3585_v63  ;;  %v3192_v59 = vld [vmem:[%s3963_s1 + $0x128] sm:$0xff]   ;;  %v3193_v63 = vld [vmem:[%s3963_s1 + $0x130] sm:$0xff]  }
  0x6c   : > { %2919 = vmatpush3.bf16.msra.mxu0 %v3183_v20  ;;  %2808 = vmatprep.mubr.msk.bf16.mxu1 %vm311_vm1, %v3524_v24  ;;  %v1815_v24 = vsel %vm336_vm0, %v3190_v27, 0 }
  0x6d   : > { %2920 = vmatprep.subr.bf16.mxu0 %v3185_v52  ;;  %2821 = vmatpush3.bf16.msra.mxu1 %v1014_v9 }
  0x6e   : > { %2968 = vmatprep.subr.bf16.mxu1 %v3191_v50 }
  0x6f   : > { %2905 = vmatmul.mubr.msk.bf16.gmra.mrb[4].mxu0 %vm311_vm1, %v3663_v17 }
  0x70   : > { %2921 = vmatpush3.bf16.msra.mxu0 %v3185_v52  ;;  %2908 = vmatprep.mubr.msk.bf16.mxu0 %vm311_vm1, %v3686_v4 }
  0x71   : > { %2922 = vmatprep.subr.bf16.mxu0 %v3187_v43 }
  0x73   : > { %2809 = vmatmul.mubr.msk.bf16.gmra.mrb[12].mxu1 %vm311_vm1, %v2358_v48 }
  0x74   : > { %2923 = vmatpush3.bf16.msra.mxu0 %v3187_v43  ;;  %2822 = vmatprep.mubr.msk.bf16.mxu1 %vm311_vm1, %v2381_v33 }
  0x75   : > { %3113 = vmatprep.subr.msk.bf16.mxu0 %vm336_vm0, %v3190_v27 }
  0x77   : > { %2909 = vmatmul.mubr.msk.bf16.gmra.mrb[8].mxu0 %vm311_vm1, %v3695_v34 }
  0x78   : > { %2912 = vmatprep.mubr.msk.bf16.mxu0 %vm311_vm1, %v3714_v57  ;;  %2925 = vmatpush3.bf16.msra.mxu0 %v1815_v24 }
  0x79   : > { %2942 = vmatprep.subr.bf16.mxu0 %v3191_v50 }
  0x7b   : > { %2823 = vmatmul.mubr.msk.bf16.vlgmr.msra.gmra.mrb[0].mxu1 %vm311_vm1, %v3375_v6  ;;  %v3194_v6 = vld [vmem:[%s3963_s1 + $0x138] sm:$0xff]  }
  0x7c   : > { %2973 = vmatpush3.bf16.msra.mxu1 %v3191_v50  ;;  %2826 = vmatprep.mubr.msk.bf16.mxu1 %vm311_vm1, %v3408_v25 }
  0x7d   : > { %2969 = vmatprep.subr.bf16.mxu1 %v3192_v59 }
  0x7f   : > { %2913 = vmatmul.mubr.msk.bf16.gmra.mrb[12].mxu0 %vm311_vm1, %v3723_v30 }
  0x80   : > { %2926 = vmatprep.mubr.msk.bf16.mxu0 %vm311_vm1, %v3347_v47  ;;  %2974 = vmatpush3.bf16.msra.mxu1 %v3192_v59  ;;  %v3195_v47 = vld [vmem:[%s3963_s1 + $0x140] ss:$0 sps:$4 sm:$0xff]  }
  0x81   : > { %2970 = vmatprep.subr.bf16.mxu1 %v3193_v63  ;;  %v1982_v25 = vsel %vm336_vm0, %v3195_v47, 0 }
  0x83   : > { %2827 = vmatmul.mubr.msk.bf16.gmra.mrb[4].mxu1 %vm311_vm1, %v3441_v56 }
  0x84   : > { %2975 = vmatpush3.bf16.msra.mxu1 %v3193_v63  ;;  %2830 = vmatprep.mubr.msk.bf16.mxu1 %vm311_vm1, %v3479_v28 }
  0x85   : > { %2971 = vmatprep.subr.bf16.mxu1 %v3194_v6 }
  0x87   : > { %2927 = vmatmul.mubr.msk.bf16.vlgmr.msra.gmra.mrb[0].mxu0 %vm311_vm1, %v3647_v41 }
  0x88   : > { %2943 = vmatpush3.bf16.msra.mxu0 %v3191_v50  ;;  %2930 = vmatprep.mubr.msk.bf16.mxu0 %vm311_vm1, %v3663_v17 }
  0x89   : > { %2944 = vmatprep.subr.bf16.mxu0 %v3192_v59  ;;  %2976 = vmatpush3.bf16.msra.mxu1 %v3194_v6 }
  0x8a   : > { %3115 = vmatprep.subr.msk.bf16.mxu1 %vm336_vm0, %v3195_v47 }
  0x8b   : > { %2831 = vmatmul.mubr.msk.bf16.gmra.mrb[8].mxu1 %vm311_vm1, %v3515_v7 }
  0x8c   : > { %2945 = vmatpush3.bf16.msra.mxu0 %v3192_v59  ;;  %2834 = vmatprep.mubr.msk.bf16.mxu1 %vm311_vm1, %v3554_v54 }
  0x8d   : > { %2946 = vmatprep.subr.bf16.mxu0 %v3193_v63  ;;  %2977 = vmatpush3.bf16.msra.mxu1 %v1982_v25 }
  0x8f   : > { %2931 = vmatmul.mubr.msk.bf16.gmra.mrb[4].mxu0 %vm311_vm1, %v3686_v4 }
  0x90   : > { %2947 = vmatpush3.bf16.msra.mxu0 %v3193_v63  ;;  %2934 = vmatprep.mubr.msk.bf16.mxu0 %vm311_vm1, %v3695_v34 }
  0x91   : > { %2948 = vmatprep.subr.bf16.mxu0 %v3194_v6 }
  0x93   : > { %2835 = vmatmul.mubr.msk.bf16.gmra.mrb[12].mxu1 %vm311_vm1, %v3571_v32 }
  0x94   : > { %2949 = vmatpush3.bf16.msra.mxu0 %v3194_v6  ;;  %2960 = vmatprep.mubr.msk.bf16.mxu1 %vm311_vm1, %v3714_v57 }
  0x95   : > { %3114 = vmatprep.subr.msk.bf16.mxu0 %vm336_vm0, %v3195_v47 }
  0x97   : > { %2935 = vmatmul.mubr.msk.bf16.gmra.mrb[8].mxu0 %vm311_vm1, %v3714_v57 }
  0x98   : > { %2938 = vmatprep.mubr.msk.bf16.mxu0 %vm311_vm1, %v3723_v30  ;;  %2951 = vmatpush3.bf16.msra.mxu0 %v1982_v25 }
  0x9b   : > { %2961 = vmatmul.mubr.msk.bf16.vlgmr.msra.gmra.mrb[16].mxu1 %vm311_vm1, %v3723_v30 }
  0x9c   : > { %2964 = vmatprep.mubr.msk.bf16.mxu1 %vm311_vm1, %v3751_v14 }
  0x9f   : > { %2939 = vmatmul.mubr.msk.bf16.gmra.mrb[12].mxu0 %vm311_vm1, %v3751_v14 }
  0xa0   : > { %2952 = vmatprep.mubr.msk.bf16.mxu0 %vm311_vm1, %v3647_v41 }
  0xa3   : > { %2965 = vmatmul.mubr.msk.bf16.gmra.mrb[20].mxu1 %vm311_vm1, %v2520_v55 }
  0xa7   : > { %2953 = vmatmul.mubr.msk.bf16.vlgmr.msra.gmra.mrb[0].mxu0 %vm311_vm1, %v3663_v17 }
  0xa8   : > { %2956 = vmatprep.mubr.msk.bf16.mxu0 %vm311_vm1, %v3686_v4 }
  0xaf   : > { %2957 = vmatmul.mubr.msk.bf16.gmra.mrb[4].mxu0 %vm311_vm1, %v3695_v34 }
 0x14e   : > { %v2824_v56 = vpop.f32.mrb[0].mxu1 }
 0x14f   : > { %v3897_v28 = vpop.f32.mrb[1].mxu1 }
 0x150   : > { %v3899_v7 = vpop.f32.mrb[2].mxu1 }
 0x151   : > { %v3901_v54 = vpop.f32.mrb[3].mxu1 }
 0x156   : > { %v3903_v32 = vpop.f32.mrb[4].mxu1 }
 0x157   : > { %v3905_v41 = vpop.f32.mrb[5].mxu1 }
 0x158   : > { %v3907_v8 = vpop.f32.mrb[6].mxu1 }
 0x159   : > { %v3909_v17 = vpop.f32.mrb[7].mxu1 }
 0x15e   : > { %v2832_v57 = vpop.f32.mrb[8].mxu1 }
 0x15f   : > { %v1082_v4 = vpop.f32.mrb[9].mxu1 }
 0x160   : > { %v2833_v40 = vpop.f32.mrb[10].mxu1 }
 0x161   : > { %v1085_v11 = vpop.f32.mrb[11].mxu1 }
 0x166   : > { %v2836_v34 = vpop.f32.mrb[12].mxu1 }
 0x167   : > { %v1098_v18 = vpop.f32.mrb[13].mxu1 }
 0x168   : > { %v2837_v31 = vpop.f32.mrb[14].mxu1 }
 0x169   : > { %v1101_v45 = vpop.f32.mrb[15].mxu1 }
 0x16a   : > { %v2936_v30 = vpop.f32.mrb[8].mxu0 }
 0x16b   : > { %v2986_v22 = vadd.f32 %v2936_v30, %v2832_v57  ;;  %v1883_v23 = vpop.f32.mrb[9].mxu0 }
 0x16c   : > { %v2988_v21 = vadd.f32 %v1883_v23, %v1082_v4  ;;  %v2937_v39 = vpop.f32.mrb[10].mxu0 }
 0x16d   : > { %v2990_v44 = vadd.f32 %v2937_v39, %v2833_v40  ;;  %v1886_v37 = vpop.f32.mrb[11].mxu0 }
 0x16e   : > { %v2992_v3 = vadd.f32 %v1886_v37, %v1085_v11  ;;  %v2962_v53 = vpop.f32.mrb[16].mxu1 }
 0x16f   : > { %v2987_v5 = vadd.f32 %v2986_v22, %v2962_v53  ;;  %v2050_v12 = vpop.f32.mrb[17].mxu1 }
 0x170   : > { %v2989_v61 = vadd.f32 %v2988_v21, %v2050_v12  ;;  %v2963_v60 = vpop.f32.mrb[18].mxu1 }
 0x171   : > { %v2114_v36 = vadd.f32 %v2987_v5, %v3914_v15  ;;  %v2991_v0 = vadd.f32 %v2990_v44, %v2963_v60  ;;  %v2053_v29 = vpop.f32.mrb[19].mxu1 }
 0x172   : > { %v2940_v51 = vpop.f32.mrb[12].mxu0  ;;  %v2112_v2 = vadd.f32 %v2989_v61, %v3914_v15  ;;  %v2993_v14 = vadd.f32 %v2992_v3, %v2053_v29 }
 0x173   : > { %v2994_v49 = vadd.f32 %v2940_v51, %v2836_v34  ;;  %v1899_v26 = vpop.f32.mrb[13].mxu0  ;;  %v2115_v55 = vadd.f32 %v2991_v0, %v3914_v15  ;;  %v2130_v1 = vmax.f32 %v2114_v36, 0.0 }
 0x174   : > { %v2996_v62 = vadd.f32 %v1899_v26, %v1098_v18  ;;  %v2941_v38 = vpop.f32.mrb[14].mxu0  ;;  %v2113_v46 = vadd.f32 %v2993_v14, %v3914_v15  ;;  %v2128_v13 = vmax.f32 %v2112_v2, 0.0 }
 0x175   : > { %v2998_v42 = vadd.f32 %v2941_v38, %v2837_v31  ;;  %v1902_v19 = vpop.f32.mrb[15].mxu0  ;;  %v2131_v35 = vmax.f32 %v2115_v55, 0.0 }
 0x176   : > { %v3000_v33 = vadd.f32 %v1902_v19, %v1101_v45  ;;  %v2129_v16 = vmax.f32 %v2113_v46, 0.0  ;;  %v2966_v58 = vpop.f32.mrb[20].mxu1 }
 0x177   : > { %v2598_v20 = vpack.c.bf16 %v2131_v35, %v2130_v1  ;;  %v2995_v10 = vadd.f32 %v2994_v49, %v2966_v58  ;;  %v2066_v52 = vpop.f32.mrb[21].mxu1 }
 0x178   : > { %v2593_v50 = vpack.c.bf16 %v2129_v16, %v2128_v13  ;;  %v2997_v43 = vadd.f32 %v2996_v62, %v2066_v52  ;;  %v2967_v48 = vpop.f32.mrb[22].mxu1 }
 0x179   : > { %2614 = vst [vmem:[%s3924_s24 + $0x28] sm:$0xff] %v2598_v20   ;;  %v2118_v59 = vadd.f32 %v2995_v10, %v3914_v15  ;;  %v2999_v63 = vadd.f32 %v2998_v42, %v2967_v48  ;;  %v2069_v6 = vpop.f32.mrb[23].mxu1 }
 0x17a   : > { %v2954_v9 = vpop.f32.mrb[0].mxu0  ;;  %2613 = vst [vmem:[%s3924_s24 + $0x20] sm:$0xff] %v2593_v50   ;;  %v2116_v57 = vadd.f32 %v2997_v43, %v3914_v15  ;;  %v3001_v4 = vadd.f32 %v3000_v33, %v2069_v6 }
 0x17b   : > { %v2978_v27 = vadd.f32 %v2954_v9, %v2824_v56  ;;  %v2018_v24 = vpop.f32.mrb[1].mxu0  ;;  %v2119_v56 = vadd.f32 %v2999_v63, %v3914_v15  ;;  %v2134_v22 = vmax.f32 %v2118_v59, 0.0 }
 0x17c   : > { %v2979_v47 = vadd.f32 %v2018_v24, %v3897_v28  ;;  %v2955_v25 = vpop.f32.mrb[2].mxu0  ;;  %v2117_v31 = vadd.f32 %v3001_v4, %v3914_v15  ;;  %v2132_v21 = vmax.f32 %v2116_v57, 0.0 }
 0x17d   : > { %v2106_v40 = vadd.f32 %v2978_v27, %v3914_v15  ;;  %v2980_v11 = vadd.f32 %v2955_v25, %v3899_v7  ;;  %v2021_v34 = vpop.f32.mrb[3].mxu0  ;;  %v2135_v23 = vmax.f32 %v2119_v56, 0.0 }
 0x17e   : > { %v2104_v18 = vadd.f32 %v2979_v47, %v3914_v15  ;;  %v2981_v30 = vadd.f32 %v2021_v34, %v3901_v54  ;;  %v2133_v39 = vmax.f32 %v2117_v31, 0.0 }
 0x17f   : > { %v2107_v28 = vadd.f32 %v2980_v11, %v3914_v15  ;;  %v2122_v7 = vmax.f32 %v2106_v40, 0.0  ;;  %v2608_v37 = vpack.c.bf16 %v2135_v23, %v2134_v22 }
 0x180   : > { %v2105_v45 = vadd.f32 %v2981_v30, %v3914_v15  ;;  %v2120_v3 = vmax.f32 %v2104_v18, 0.0  ;;  %v2603_v5 = vpack.c.bf16 %v2133_v39, %v2132_v21 }
 0x181   : > { %v2123_v44 = vmax.f32 %v2107_v28, 0.0  ;;  %2616 = vst [vmem:[%s3924_s24 + $0x38] sm:$0xff] %v2608_v37  }
 0x182   : > { %v2121_v53 = vmax.f32 %v2105_v45, 0.0  ;;  %v2958_v54 = vpop.f32.mrb[4].mxu0  ;;  %2615 = vst [vmem:[%s3924_s24 + $0x30] sm:$0xff] %v2603_v5  }
 0x183   : > { %v2578_v12 = vpack.c.bf16 %v2123_v44, %v2122_v7  ;;  %v2982_v51 = vadd.f32 %v2958_v54, %v3903_v32  ;;  %v2034_v61 = vpop.f32.mrb[5].mxu0 }
 0x184   : > { %v2573_v60 = vpack.c.bf16 %v2121_v53, %v2120_v3  ;;  %v2983_v49 = vadd.f32 %v2034_v61, %v3905_v41  ;;  %v2959_v26 = vpop.f32.mrb[6].mxu0 }
 0x185   : > { %2610 = vst [vmem:[%s3924_s24 + $0x8] sm:$0xff] %v2578_v12   ;;  %v2110_v36 = vadd.f32 %v2982_v51, %v3914_v15  ;;  %v2984_v0 = vadd.f32 %v2959_v26, %v3907_v8  ;;  %v2037_v29 = vpop.f32.mrb[7].mxu0 }
 0x186   : > { %2574 = vst [vmem:[%s3924_s24] sm:$0xff] %v2573_v60   ;;  %v2108_v62 = vadd.f32 %v2983_v49, %v3914_v15  ;;  %v2985_v32 = vadd.f32 %v2037_v29, %v3909_v17 }
 0x187   : > { %v2111_v38 = vadd.f32 %v2984_v0, %v3914_v15  ;;  %v2126_v41 = vmax.f32 %v2110_v36, 0.0 }
 0x188   : > { %v2109_v2 = vadd.f32 %v2985_v32, %v3914_v15  ;;  %v2124_v42 = vmax.f32 %v2108_v62, 0.0 }
 0x189   : > { %v2127_v14 = vmax.f32 %v2111_v38, 0.0 }
 0x18a   : > { %v2125_v19 = vmax.f32 %v2109_v2, 0.0 }
 0x18b   : > { %v2588_v55 = vpack.c.bf16 %v2127_v14, %v2126_v41 }
 0x18c   : > { %v2583_v33 = vpack.c.bf16 %v2125_v19, %v2124_v42 }
 0x18d   : > { %2612 = vst [vmem:[%s3924_s24 + $0x18] sm:$0xff] %v2588_v55  }
 0x18e   : > { %2611 = vst [vmem:[%s3924_s24 + $0x10] sm:$0xff] %v2583_v33  }
 0x18f PF: > { %s13_s14 = sadd.s32 1, %s3218_s14   ;;  %s3970_s12 = smov %s3214_s13 }
 0x190   : > { %p10_p5 = scmp.ge.s32.totalorder %s13_s14, 4   ;;  %s3971_s13 = smov %s3973_s15 }
 0x192   :  { %12 = sbr.rel (!%p10_p5) target bundleno = 2 (0x2), region = 70 }

</bundles_post_ra>
